<compile_context>
chip_gen: v7x
topology: tpu7x:2x2x1
jax: 0.10.0
libtpu: 0.0.40
codegen_flags: <defaults>
</compile_context>

<pallas_src>
import jax
import jax.numpy as jnp
from jax.experimental import pallas as pl
from jax.experimental.pallas import tpu as pltpu


def _dma_copy_kernel(x_hbm, o_hbm, sem):
    # Single HBM->HBM DMA: identity is pure data movement, so skip VMEM entirely.
    cp = pltpu.make_async_copy(x_hbm, o_hbm, sem)
    cp.start()
    cp.wait()


def _pallas_identity(x):
    """Identity copy of x via one HBM->HBM DMA (no grid, no VMEM staging)."""
    return pl.pallas_call(
        _dma_copy_kernel,
        out_shape=jax.ShapeDtypeStruct(x.shape, x.dtype),
        in_specs=[pl.BlockSpec(memory_space=pl.ANY)],
        out_specs=pl.BlockSpec(memory_space=pl.ANY),
        scratch_shapes=[pltpu.SemaphoreType.DMA(())],
    )(x)


class SDENetSourcePallas:
    """JAX/Pallas port of SDENet_Source.

    The PyTorch module defines no parameters and its forward body is empty
    (returns None).  forward() mirrors that exactly as a true no-op — no kernel
    launch, no HBM traffic, no device sync.  The Pallas identity path over the
    speech tensor is exposed separately via kernel_output() for testing.
    """

    def __init__(self):
        # Reference __init__ creates no parameters; nothing to initialize.
        pass

    def forward(self, x):
        # Reference forward body is empty: perform no computation, return None.
        del x
        return None

    # Expose the (optimized) Pallas identity kernel for testing the Pallas path.
    def kernel_output(self, x):
        return _pallas_identity(x)


if __name__ == "__main__":
    key = jax.random.PRNGKey(0)
    # Small speech-feature-like input: batch=2, 16 frames, 128-dim features.
    x = jax.random.normal(key, (2, 16, 128), dtype=jnp.float32)

    model = SDENetSourcePallas()

    # Run the Pallas kernel once and verify it is a faithful identity over x.
    y = model.kernel_output(x)
    y = jax.block_until_ready(y)
    assert y.shape == x.shape and y.dtype == x.dtype
    assert bool(jnp.all(y == x))

    # Exact forward semantics: no computation, returns None.
    d = model.forward(x)
    assert d is None

    print("KERNEL_OK")
</pallas_src>

<mosaic_0001>
module attributes {stable_mosaic.version = 11 : i64} {
  func.func @_dma_copy_kernel(%arg0: memref<2x16x128xf32, #tpu.memory_space<any>>, %arg1: memref<2x16x128xf32, #tpu.memory_space<any>>, %arg2: memref<!tpu.dma_semaphore, #tpu.memory_space<semaphore_mem>>) attributes {dimension_semantics = [], scalar_prefetch = 0 : i64, scratch_operands = 1 : i64, tpu.core_type = #tpu.core_type<tc>} {
    tpu.enqueue_dma source(%arg0 : memref<2x16x128xf32, #tpu.memory_space<any>>) target(%arg1 : memref<2x16x128xf32, #tpu.memory_space<any>>) target_semaphore(%arg2 : memref<!tpu.dma_semaphore, #tpu.memory_space<semaphore_mem>>)
    tpu.wait_dma2 semaphore(%arg2 : memref<!tpu.dma_semaphore, #tpu.memory_space<semaphore_mem>>) src(%arg0 : memref<2x16x128xf32, #tpu.memory_space<any>>) dst(%arg1 : memref<2x16x128xf32, #tpu.memory_space<any>>)
    return
  }
}

</mosaic_0001>

<bundles_post_ra>
// kernel: tpu_custom_call.1
= control target key start
LH: loop header
LB: loop body
LE: loop exit
PB: predicated region body
PF: predicated region fallthrough
CT: control target
= control target key end

     0   :  { %s35_s6 = smov [#allocation2]   ;;  %s36_s7 = smov [#allocation3]   ;;  %s54_s0 = inlined_call_operand.hbm [shape: f32[2,16,128], index: 0, kind: input, shape index: {}]   ;;  %s55_s1 = inlined_call_operand.hbm [shape: f32[2,16,128], index: 1, kind: output, shape index: {}]  }
   0x1   :  { %s37_s8 = smov 0  }
   0x2   :  { %18 = dma.general %s54_s0, 512, %s55_s1, %s35_s6, %s36_s7, [#allocation4], %s37_s8, 0  }
   0x3   :  { %33 = dma.done.wait [#allocation2], 512 }
   0x4   :  { %34 = vsyncadd [#allocation2], 4294966784 }
   0x5   :  { %23 = vsyncmov [#allocation2] }
   0x8   :  { %s24_s13 = vpop.sfrf %23 }
   0x9   :  { %p29_p0 = scmp.ne.s32.totalorder %s24_s13, 0 }
   0xb   :  { %28 = shalt.err (%p29_p0)  }

</bundles_post_ra>
